<compile_context>
chip_gen: v5e
topology: v5e:2x2
jax: 0.10.0
libtpu: 0.0.40
codegen_flags: <defaults>
</compile_context>

<pallas_src>
import jax
import jax.numpy as jnp
from jax import lax
from jax.experimental import pallas as pl
from jax.experimental.pallas import tpu as pltpu


def _round_up(x: int, m: int) -> int:
    return ((x + m - 1) // m) * m


def _linear_relu_kernel(x_ref, w_ref, o_ref, acc_ref):
    """One (tm, tn) output tile; accumulates over the K grid axis (axis 2)."""

    @pl.when(pl.program_id(2) == 0)
    def _init():
        acc_ref[...] = jnp.zeros_like(acc_ref)

    # x_ref: (tm, tk); w_ref: (tn, tk)  (PyTorch (D_out, D_in) layout).
    # Contract dim 1 of both operands -> (tm, tn); MXU matmul with f32 accumulate.
    acc_ref[...] += lax.dot_general(
        x_ref[...],
        w_ref[...],
        dimension_numbers=(((1,), (1,)), ((), ())),
        preferred_element_type=jnp.float32,
    )

    @pl.when(pl.program_id(2) == pl.num_programs(2) - 1)
    def _finalize():
        o_ref[...] = jnp.maximum(acc_ref[...], 0.0).astype(o_ref.dtype)


def linear_relu(x, weight, *, tm=256, tn=256, tk=512, compute_dtype=None):
    """relu(x @ weight.T)

    x:      (B, D_in)      float32
    weight: (D_out, D_in)  float32   (PyTorch nn.Linear convention, bias=False)
    compute_dtype: optionally cast matmul inputs (e.g. jnp.bfloat16 on v6e/v7x);
                   accumulation is always f32.
    """
    B, K = x.shape
    N, K_w = weight.shape
    assert K == K_w, "weight must be (D_out, D_in)"
    out_dtype = x.dtype

    # Clamp tiles to the (aligned) problem size so tiny shapes stay single-block.
    tm = min(tm, _round_up(B, 8))
    tn = min(tn, _round_up(N, 128))
    tk = min(tk, _round_up(K, 128))

    # Pad to whole tiles: sublane-aligned B, lane-dense N and K.  Zero padding is exact for
    # relu(matmul); the padded output columns/rows are sliced off below.
    B_p, N_p, K_p = _round_up(B, tm), _round_up(N, tn), _round_up(K, tk)
    if (B_p, K_p) != (B, K):
        x = jnp.pad(x, ((0, B_p - B), (0, K_p - K)))
    if (N_p, K_p) != (N, K):
        weight = jnp.pad(weight, ((0, N_p - N), (0, K_p - K)))
    if compute_dtype is not None:
        x = x.astype(compute_dtype)
        weight = weight.astype(compute_dtype)

    grid = (B_p // tm, N_p // tn, K_p // tk)

    out_p = pl.pallas_call(
        _linear_relu_kernel,
        out_shape=jax.ShapeDtypeStruct((B_p, N_p), out_dtype),
        grid=grid,
        in_specs=[
            pl.BlockSpec((tm, tk), lambda i, j, k: (i, k)),  # x tile
            pl.BlockSpec((tn, tk), lambda i, j, k: (j, k)),  # weight tile (D_out, D_in)
        ],
        out_specs=pl.BlockSpec((tm, tn), lambda i, j, k: (i, j)),
        scratch_shapes=[pltpu.VMEM((tm, tn), jnp.float32)],
        compiler_params=pltpu.CompilerParams(
            dimension_semantics=("parallel", "parallel", "arbitrary"),
        ),
        cost_estimate=pl.CostEstimate(
            flops=2 * B_p * N_p * K_p,
            transcendentals=0,
            bytes_accessed=x.dtype.itemsize * (B_p * K_p + N_p * K_p)
            + out_dtype.itemsize * B_p * N_p,
        ),
    )(x, weight)

    if (B_p, N_p) != (B, N):
        out_p = out_p[:B, :N]
    return out_p


if __name__ == "__main__":
    key = jax.random.PRNGKey(0)
    kx, kw, kx2, kw2 = jax.random.split(key, 4)

    # Shapes implied by the module: nn.Linear(input_dim, output_dim, bias=False) + ReLU.
    batch, input_dim, output_dim = 8, 32, 16
    x = jax.random.normal(kx, (batch, input_dim), dtype=jnp.float32)
    bound = 1.0 / (input_dim ** 0.5)  # nn.Linear default init U(-1/sqrt(in), 1/sqrt(in))
    weight = jax.random.uniform(
        kw, (output_dim, input_dim), minval=-bound, maxval=bound, dtype=jnp.float32
    )

    out = linear_relu(x, weight)
    jax.block_until_ready(out)
    ref = jnp.maximum(x @ weight.T, 0.0)
    assert out.shape == (batch, output_dim)
    assert jnp.allclose(out, ref, atol=1e-5, rtol=1e-5)

    # Also exercise the tiled multi-block path (grid = (2, 2, 2): M/N/K tiling + accumulator).
    B2, K2, N2 = 512, 640, 384
    x2 = jax.random.normal(kx2, (B2, K2), dtype=jnp.float32)
    w2 = jax.random.normal(kw2, (N2, K2), dtype=jnp.float32) * (1.0 / (K2 ** 0.5))
    out2 = linear_relu(x2, w2)
    jax.block_until_ready(out2)
    ref2 = jnp.maximum(x2 @ w2.T, 0.0)
    assert out2.shape == (B2, N2)
    assert jnp.allclose(out2, ref2, atol=2e-4, rtol=2e-4)

    print("KERNEL_OK")
</pallas_src>

<mosaic_0001>
module attributes {stable_mosaic.version = 11 : i64} {
  func.func @_linear_relu_kernel(%arg0: i32, %arg1: i32, %arg2: i32, %arg3: memref<8x128xf32, #tpu.memory_space<vmem>>, %arg4: memref<128x128xf32, #tpu.memory_space<vmem>>, %arg5: memref<8x128xf32, #tpu.memory_space<vmem>>, %arg6: memref<8x128xf32, #tpu.memory_space<vmem>>) attributes {dimension_semantics = [#tpu.dimension_semantics<parallel>, #tpu.dimension_semantics<parallel>, #tpu.dimension_semantics<arbitrary>], iteration_bounds = array<i64: 1, 1, 1>, scalar_prefetch = 0 : i64, scratch_operands = 1 : i64, tpu.core_type = #tpu.core_type<tc>, window_params = [{transform_indices = @transform_0, window_bounds = array<i64: 8, 128>}, {transform_indices = @transform_1, window_bounds = array<i64: 128, 128>}, {transform_indices = @transform_2, window_bounds = array<i64: 8, 128>}]} {
    %c0_i32 = arith.constant 0 : i32
    %0 = arith.cmpi eq, %arg2, %c0_i32 : i32
    %1 = arith.extui %0 : i1 to i32
    %c0_i32_0 = arith.constant 0 : i32
    %2 = arith.cmpi ne, %1, %c0_i32_0 : i32
    scf.if %2 {
      %cst_10 = arith.constant 0.000000e+00 : f32
      %12 = vector.broadcast %cst_10 : f32 to vector<8x128xf32>
      %c0_11 = arith.constant 0 : index
      %c0_12 = arith.constant 0 : index
      %13 = vector.load %arg6[%c0_11, %c0_12] : memref<8x128xf32, #tpu.memory_space<vmem>>, vector<8x128xf32>
      tpu.vector_store %arg6[%c0_11, %c0_12], %12 {strides = array<i32>} : memref<8x128xf32, #tpu.memory_space<vmem>>, vector<8x128xf32>,
    } else {
    }
    %c0 = arith.constant 0 : index
    %c0_1 = arith.constant 0 : index
    %3 = vector.load %arg6[%c0, %c0_1] : memref<8x128xf32, #tpu.memory_space<vmem>>, vector<8x128xf32>
    %c0_2 = arith.constant 0 : index
    %c0_3 = arith.constant 0 : index
    %4 = vector.load %arg3[%c0_2, %c0_3] : memref<8x128xf32, #tpu.memory_space<vmem>>, vector<8x128xf32>
    %c0_4 = arith.constant 0 : index
    %c0_5 = arith.constant 0 : index
    %5 = vector.load %arg4[%c0_4, %c0_5] : memref<128x128xf32, #tpu.memory_space<vmem>>, vector<128x128xf32>
    %cst = arith.constant dense<0.000000e+00> : vector<8x128xf32>
    %6 = tpu.matmul %4, %5, %cst {dimension_numbers = #tpu.dot_dimension_numbers<[1], [1], [0], [0], [0, 0, 1, 0], [], []>} : vector<8x128xf32>, vector<128x128xf32>, vector<8x128xf32> -> vector<8x128xf32>
    %7 = arith.addf %3, %6 : vector<8x128xf32>
    %c0_6 = arith.constant 0 : index
    %c0_7 = arith.constant 0 : index
    %8 = vector.load %arg6[%c0_6, %c0_7] : memref<8x128xf32, #tpu.memory_space<vmem>>, vector<8x128xf32>
    tpu.vector_store %arg6[%c0_6, %c0_7], %7 {strides = array<i32>} : memref<8x128xf32, #tpu.memory_space<vmem>>, vector<8x128xf32>,
    %c0_i32_8 = arith.constant 0 : i32
    %9 = arith.cmpi eq, %arg2, %c0_i32_8 : i32
    %10 = arith.extui %9 : i1 to i32
    %c0_i32_9 = arith.constant 0 : i32
    %11 = arith.cmpi ne, %10, %c0_i32_9 : i32
    scf.if %11 {
      %c0_10 = arith.constant 0 : index
      %c0_11 = arith.constant 0 : index
      %12 = vector.load %arg6[%c0_10, %c0_11] : memref<8x128xf32, #tpu.memory_space<vmem>>, vector<8x128xf32>
      %cst_12 = arith.constant 0.000000e+00 : f32
      %13 = vector.broadcast %cst_12 : f32 to vector<8x128xf32>
      %14 = arith.maximumf %12, %13 : vector<8x128xf32>
      %c0_13 = arith.constant 0 : index
      %c0_14 = arith.constant 0 : index
      %15 = vector.load %arg5[%c0_13, %c0_14] : memref<8x128xf32, #tpu.memory_space<vmem>>, vector<8x128xf32>
      tpu.vector_store %arg5[%c0_13, %c0_14], %14 {strides = array<i32>} : memref<8x128xf32, #tpu.memory_space<vmem>>, vector<8x128xf32>,
    } else {
    }
    return
  }
  func.func @transform_0(%arg0: i32, %arg1: i32, %arg2: i32) -> (i32, i32) {
    %c0_i32 = arith.constant 0 : i32
    return %arg0, %arg2 : i32, i32
  }
  func.func @transform_1(%arg0: i32, %arg1: i32, %arg2: i32) -> (i32, i32) {
    %c0_i32 = arith.constant 0 : i32
    return %arg1, %arg2 : i32, i32
  }
  func.func @transform_2(%arg0: i32, %arg1: i32, %arg2: i32) -> (i32, i32) {
    %c0_i32 = arith.constant 0 : i32
    return %arg0, %arg1 : i32, i32
  }
}

</mosaic_0001>

<bundles_post_ra>
// kernel: tpu_custom_call.1
= control target key start
LH: loop header
LB: loop body
LE: loop exit
PB: predicated region body
PF: predicated region fallthrough
CT: control target
= control target key end

     0   :  { %7 = vsyncpa [#allocation4], 0  ;;  %s223_s0 = inlined_call_operand.hbm [shape: f32[8,128], index: 0, kind: input, shape index: {}]   ;;  %s224_s1 = inlined_call_operand.hbm [shape: f32[128,128], index: 1, kind: input, shape index: {}]   ;;  %s225_s2 = inlined_call_operand.hbm [shape: f32[8,128], index: 2, kind: output, shape index: {}]  }
   0x1   :  { %8 = vsyncpa [#allocation7], 0 }
   0x2   :  { %9 = vsyncpa [#allocation5], 0  ;;  %s15_s11 = sshll.u32 %s223_s0, 4  ;;  %s194_s12 = smov [#allocation3]   ;;  %s16_s11 = int_to_ptr.hbm [resolvable:$true] %s15_s11 }
   0x3   :  { %s17_s13 = sshll.u32 %s194_s12, 4  ;;  %s25_s16 = sshll.u32 %s224_s1, 4  ;;  %s18_s13 = int_to_ptr.vmem [resolvable:$true] %s17_s13  ;;  %s26_s16 = int_to_ptr.hbm [resolvable:$true] %s25_s16 }
   0x4   :  { %20 = dma.hbm_to_vmem [thread:$0]  %s16_s11, 128, %s18_s13, [#allocation4]  }
   0x5   :  { %s195_s17 = smov [#allocation6]   ;;  %s196_s19 = smov 128  }
   0x6   :  { %s27_s18 = sshll.u32 %s195_s17, 4  ;;  %s197_s20 = smov 8   ;;  %s28_s18 = int_to_ptr.vmem [resolvable:$true] %s27_s18 }
   0x7   :  { %33 = dma.hbm_to_vmem [thread:$0]  %s26_s16, 2048, %s28_s18, [#allocation7], %s196_s19, %s196_s19, %s197_s20  }
   0x8   :  { %188 = dma.done.wait [#allocation4], 128  }
   0x9   :  { %189 = vsyncadd [#allocation4], 4294967168 }
   0xa   :  { %190 = dma.done.wait [#allocation7], 2048  }
   0xb   :  { %191 = vsyncadd [#allocation7], 4294965248  ;;  %v64_v0 = vld [vmem:[#allocation6 + $0x78] sm:$0xff]  ;;  %v63_v1 = vld [vmem:[#allocation6 + $0x70] sm:$0xff]  ;;  %s198_s0 = smov [#allocation8]   ;;  %s100_s23 = sshll.u32 %s225_s2, 4  ;;  %s101_s23 = int_to_ptr.hbm [resolvable:$true] %s100_s23 }
   0xc   :  { %65 = vmatpush.xpose.msra.mxu0 %v64_v0  ;;  %v62_v2 = vld [vmem:[#allocation6 + $0x68] sm:$0xff]  ;;  %v61_v3 = vld [vmem:[#allocation6 + $0x60] sm:$0xff]  ;;  %v60_v4 = vld [vmem:[#allocation6 + $0x58] sm:$0xff]  ;;  %s98_s1 = sshll.u32 %s198_s0, 4  ;;  %s99_s1 = int_to_ptr.vmem [resolvable:$true] %s98_s1 }
   0xd   :  { %v59_v5 = vld [vmem:[#allocation6 + $0x50] sm:$0xff]  ;;  %v58_v6 = vld [vmem:[#allocation6 + $0x48] sm:$0xff]  ;;  %v57_v7 = vld [vmem:[#allocation6 + $0x40] sm:$0xff] }
   0xe   :  { %v56_v8 = vld [vmem:[#allocation6 + $0x38] sm:$0xff]  ;;  %v55_v9 = vld [vmem:[#allocation6 + $0x30] sm:$0xff]  ;;  %v54_v10 = vld [vmem:[#allocation6 + $0x28] sm:$0xff] }
   0xf   :  { %v53_v11 = vld [vmem:[#allocation6 + $0x20] sm:$0xff]  ;;  %v52_v12 = vld [vmem:[#allocation6 + $0x18] sm:$0xff]  ;;  %v51_v13 = vld [vmem:[#allocation6 + $0x10] sm:$0xff] }
  0x10   :  { %66 = vmatpush.xpose.msra.mxu0 %v63_v1  ;;  %v50_v14 = vld [vmem:[#allocation6 + $0x8] sm:$0xff]  ;;  %v49_v15 = vld [vmem:[#allocation6] sm:$0xff]  ;;  %v48_v16 = vld [vmem:[#allocation3] sm:$0xff] }
  0x14   :  { %67 = vmatpush.xpose.msra.mxu0 %v62_v2 }
  0x18   :  { %68 = vmatpush.xpose.msra.mxu0 %v61_v3 }
  0x1c   :  { %69 = vmatpush.xpose.msra.mxu0 %v60_v4 }
  0x20   :  { %70 = vmatpush.xpose.msra.mxu0 %v59_v5 }
  0x24   :  { %71 = vmatpush.xpose.msra.mxu0 %v58_v6 }
  0x28   :  { %72 = vmatpush.xpose.msra.mxu0 %v57_v7 }
  0x2c   :  { %73 = vmatpush.xpose.msra.mxu0 %v56_v8 }
  0x30   :  { %74 = vmatpush.xpose.msra.mxu0 %v55_v9 }
  0x34   :  { %75 = vmatpush.xpose.msra.mxu0 %v54_v10 }
  0x38   :  { %76 = vmatpush.xpose.msra.mxu0 %v53_v11 }
  0x3c   :  { %77 = vmatpush.xpose.msra.mxu0 %v52_v12 }
  0x40   :  { %78 = vmatpush.xpose.msra.mxu0 %v51_v13 }
  0x44   :  { %79 = vmatpush.xpose.msra.mxu0 %v50_v14 }
  0x48   :  { %80 = vmatpush.xpose.msra.mxu0 %v49_v15 }
  0x4b   :  { %81 = vmatmul.f32.vlgmr.msra.gmra.mxu0 %v48_v16 }
  0xc8   :  { %v82_v17 = vpop.f32.mrf.mxu0 }
  0xc9   :  { %v91_v18 = vmax.f32 %v82_v17, 0.0 }
  0xcb   :  { %92 = vst [vmem:[#allocation8] sm:$0xff] %v91_v18 }
  0xcc   :  { %103 = dma.vmem_to_hbm [thread:$0]  %s99_s1, 128, %s101_s23, [#allocation5]  }
  0xcd   :  { %192 = dma.done.wait [#allocation5], 128  }
  0xce   :  { %193 = vsyncadd [#allocation5], 4294967168 }
  0xcf   :  { %108 = vsyncpa [#allocation4], 1 }
  0xd0   :  { %109 = vsyncpa [#allocation7], 1 }
  0xd1   :  { %110 = vsyncpa [#allocation5], 1 }

</bundles_post_ra>
